<compile_context>
chip_gen: v7x
topology: tpu7x:2x2x1
jax: 0.10.0
libtpu: 0.0.40
codegen_flags: <defaults>
</compile_context>

<pallas_src>
import functools

import numpy as np
import jax
import jax.numpy as jnp
from jax.experimental import pallas as pl
from jax.experimental.pallas import tpu as pltpu

NUM_CLASSES_PAD = 128   # logits stored lane-dense; real classes sliced outside
DEFAULT_GROUP = 8       # images fused per grid step (raises matmul M to 256)


# --------------------------------------------------------------------------
# pltpu.roll direction probe (one tiny kernel, run once at prepare time).
# The main kernel's row shifts must match jnp.roll semantics; probing removes
# any dependence on the hardware rotate direction convention.
# --------------------------------------------------------------------------
@functools.lru_cache(maxsize=None)
def _roll_is_numpy_convention() -> bool:
    """True iff pltpu.roll(x, s, axis=0)[i] == x[i - s] (jnp.roll semantics)."""
    def k(x_ref, o_ref):
        o_ref[...] = pltpu.roll(x_ref[...], 1, axis=0)

    x = jnp.arange(8 * 128, dtype=jnp.float32).reshape(8, 128)
    y = pl.pallas_call(k, out_shape=jax.ShapeDtypeStruct((8, 128), jnp.float32))(x)
    return bool(jnp.allclose(y[1], x[0]))


# --------------------------------- kernel ----------------------------------

def fused_kernel(x_ref, *rest, plan):
    """Forward for one group of G images; activations are (G*H, W*C) slabs."""
    out_ref = rest[-1]
    refs = rest[:-1]

    def conv(a, cd, relu, extra=None):
        """conv + folded-BN (+ residual) (+ ReLU) on a f32 (G*h_in, w*cin) slab."""
        w_ref = refs[cd["w"]]                     # (kh, w_in*cin, w_out*cout) bf16
        a_b = a.astype(jnp.bfloat16)
        acc = None
        for dy, op in enumerate(cd["rows"]):
            kind = op[0]
            if kind == "id":                      # stride 1, dy == pad
                rows = a_b
            elif kind == "roll":                  # stride 1, dy != pad: XLU shift
                _, shift, mask = op
                rolled = pltpu.roll(a, shift=shift, axis=0)
                rows = (rolled * refs[mask][...]).astype(jnp.bfloat16)
            else:                                 # "sel": stride-2 row subsample
                rows = jnp.dot(refs[op[1]][...], a_b,
                               preferred_element_type=jnp.float32
                               ).astype(jnp.bfloat16)
            term = jnp.dot(rows, w_ref[dy], preferred_element_type=jnp.float32)
            acc = term if acc is None else acc + term
        acc = acc + refs[cd["b"]][...]            # folded-BN bias row
        if extra is not None:
            acc = acc + extra                     # residual
        if relu:
            acc = jnp.maximum(acc, 0.0)
        return acc

    a = x_ref[...]                                # (G*32, 128) f32
    a = conv(a, plan["stem"], relu=True)
    for blk in plan["blocks"]:
        t = conv(a, blk["c1"], relu=True)
        sc = a if blk["sc"] is None else conv(a, blk["sc"], relu=False)
        a = conv(t, blk["c2"], relu=True, extra=sc)    # relu(bn2 + shortcut)

    # head: per-image row-average (block-diag P), then x-folded FC matrix.
    hd = plan["head"]
    pooled = jnp.dot(refs[hd["p"]][...], a.astype(jnp.bfloat16),
                     preferred_element_type=jnp.float32)        # (G, w*c)
    logits = jnp.dot(pooled.astype(jnp.bfloat16), refs[hd["w"]][...],
                     preferred_element_type=jnp.float32)        # (G, 128)
    out_ref[...] = logits + refs[hd["b"]][...]


# ------------------- host-side parameter preparation ------------------------

def _band_tensor(w_in, w_out, stride, pad, kw):
    """B[dx, x_in, x_out] = 1 if x_in == stride*x_out + dx - pad."""
    dx = np.arange(kw)[:, None, None]
    xi = np.arange(w_in)[None, :, None]
    xo = np.arange(w_out)[None, None, :]
    return (xi == stride * xo + dx - pad).astype(np.float32)


def _band_conv(w, scale, w_in, stride):
    """(kh, kw, Cin, Cout) conv weight (+ BN scale) -> per-dy banded matrices
    (kh, w_in*Cin, w_out*Cout) bf16, so out_row(y) = sum_dy in_row(y') @ W[dy]."""
    kh, kw, cin, cout = w.shape
    pad = (kh - 1) // 2
    w_out = (w_in + 2 * pad - kw) // stride + 1
    band = _band_tensor(w_in, w_out, stride, pad, kw)             # (kw, w_in, w_out)
    ws = np.asarray(w, np.float32) * np.asarray(scale, np.float32)
    big = np.einsum("dio,ydce->yicoe", band, ws)                  # (kh,w_in,cin,w_out,cout)
    return jnp.asarray(big.reshape(kh, w_in * cin, w_out * cout), jnp.bfloat16)


def _sel_block_diag(group, h_in, h_out, stride, off):
    """Block-diagonal 0/1 S: out-row g*h_out+r picks in-row g*h_in + stride*r + off."""
    s = np.zeros((group * h_out, group * h_in), np.float32)
    r = np.arange(h_out)
    c = stride * r + off
    ok = (c >= 0) & (c < h_in)
    for g in range(group):
        s[g * h_out + r[ok], g * h_in + c[ok]] = 1.0
    return jnp.asarray(s, jnp.bfloat16)


def _roll_keep_mask(group, h, shift):
    """(G*h, 1) f32 mask zeroing rows whose source crossed an image boundary
    after jnp.roll(a, shift, axis=0) with shift = +1 / -1 per image block."""
    r = np.arange(group * h) % h
    keep = (r >= shift) if shift > 0 else (r < h + shift)
    return jnp.asarray(keep.astype(np.float32).reshape(group * h, 1))


def _pool_matrix(group, h):
    """(G, G*h) block-diagonal row-average matrix (1/h inside each image block)."""
    p = np.zeros((group, group * h), np.float32)
    for g in range(group):
        p[g, g * h:(g + 1) * h] = 1.0 / h
    return jnp.asarray(p, jnp.bfloat16)


def prepare_params(params, group=DEFAULT_GROUP, num_classes=10):
    """Fold BN, band the conv weights, precompute selection/pool/mask operands."""
    assert group % 8 == 0, "group must be a multiple of 8 (sublane-aligned output)"
    roll_sign = 1 if _roll_is_numpy_convention() else -1

    flat, sel_cache, mask_cache = [], {}, {}

    def add(arr):
        flat.append(arr)
        return len(flat) - 1

    def sel_idx(h_in, h_out, stride, off):
        key = (h_in, h_out, stride, off)
        if key not in sel_cache:
            sel_cache[key] = add(_sel_block_diag(group, h_in, h_out, stride, off))
        return sel_cache[key]

    def mask_idx(h, shift):
        key = (h, shift)
        if key not in mask_cache:
            mask_cache[key] = add(_roll_keep_mask(group, h, shift))
        return mask_cache[key]

    def conv_entry(w, scale, bias, h_in, w_in, stride):
        kh, kw, cin, cout = w.shape
        pad = (kh - 1) // 2
        h_out = (h_in + 2 * pad - kh) // stride + 1
        w_out = (w_in + 2 * pad - kw) // stride + 1
        rows = []
        for dy in range(kh):
            off = dy - pad                     # out-row y reads in-row stride*y + off
            if stride == 1 and off == 0:
                rows.append(("id",))
            elif stride == 1:
                # need in-row y+off  ->  jnp.roll by -off, then mask edge rows
                shift_arg = (roll_sign * (-off)) % (group * h_in)
                rows.append(("roll", shift_arg, mask_idx(h_in, -off)))
            else:
                rows.append(("sel", sel_idx(h_in, h_out, stride, off)))
        brow = jnp.tile(jnp.asarray(bias, jnp.float32), w_out).reshape(1, w_out * cout)
        entry = {"w": add(_band_conv(w, scale, w_in, stride)),
                 "b": add(brow),
                 "rows": tuple(rows)}
        return entry, h_out, w_out

    plan = {}
    # stem: pad Cin 3 -> 4 so the input slab is exactly 128 lanes wide
    w_stem = jnp.pad(jnp.asarray(params["conv1_w"]), ((0, 0), (0, 0), (0, 1), (0, 0)))
    plan["stem"], h, w_sp = conv_entry(w_stem, params["bn1_s"], params["bn1_b"], 32, 32, 1)

    blocks = []
    for layer_idx, first_stride in ((1, 1), (2, 2), (3, 2)):
        for blk_idx, bp in enumerate(params[f"layer{layer_idx}"]):
            s = first_stride if blk_idx == 0 else 1
            c1, h1, w1_sp = conv_entry(bp["w1"], bp["s1"], bp["b1"], h, w_sp, s)
            c2, h2, w2_sp = conv_entry(bp["w2"], bp["s2"], bp["b2"], h1, w1_sp, 1)
            sc = None
            if "ws" in bp:
                sc, _, _ = conv_entry(bp["ws"], bp["ss"], bp["bs"], h, w_sp, s)
            blocks.append({"c1": c1, "c2": c2, "sc": sc})
            h, w_sp = h2, w2_sp
    plan["blocks"] = blocks

    # head: per-image avg-pool (block-diag P) then FC folded over x positions.
    c_last = np.asarray(params["fc_w"]).shape[0]
    assert (h, w_sp) == (8, 8) and w_sp * c_last == 512, (
        "head fold assumes an (8, 8*64) final slab (CIFAR 32x32, strides 1/2/2)")
    w_head = np.tile(np.asarray(params["fc_w"], np.float32), (w_sp, 1)) / float(w_sp)
    w_head = np.pad(w_head, ((0, 0), (0, NUM_CLASSES_PAD - num_classes)))
    b_head = np.pad(np.asarray(params["fc_b"], np.float32),
                    (0, NUM_CLASSES_PAD - num_classes)).reshape(1, NUM_CLASSES_PAD)
    plan["head"] = {"p": add(_pool_matrix(group, h)),
                    "w": add(jnp.asarray(w_head, jnp.bfloat16)),
                    "b": add(jnp.asarray(b_head))}

    return {"inputs": flat, "plan": plan, "group": group, "num_classes": num_classes}


# ------------------------------ forward wrapper -----------------------------

def resnet_cifar_forward(x_nchw, prepped):
    flat, plan = prepped["inputs"], prepped["plan"]
    group, num_classes = prepped["group"], prepped["num_classes"]
    n, c, hh, ww = x_nchw.shape
    assert (c, hh, ww) == (3, 32, 32), "ResNetCIFAR expects 3x32x32 inputs"

    n_groups = -(-n // group)                       # ceil(n / group)
    n_pad = n_groups * group
    x = jnp.transpose(x_nchw, (0, 2, 3, 1)).astype(jnp.float32)   # NCHW -> NHWC
    x = jnp.pad(x, ((0, n_pad - n), (0, 0), (0, 0), (0, 1)))      # pad batch, Cin 3->4
    slab = x.reshape(n_pad * 32, 32 * 4)                          # (n_pad*32, 128)

    def const_spec(a):
        # Grid-invariant operand: constant index_map, single VMEM buffer.
        nd = a.ndim
        return pl.BlockSpec(a.shape, lambda i, _nd=nd: (0,) * _nd,
                            pipeline_mode=pl.Buffered(1))

    out = pl.pallas_call(
        functools.partial(fused_kernel, plan=plan),
        out_shape=jax.ShapeDtypeStruct((n_pad, NUM_CLASSES_PAD), jnp.float32),
        grid=(n_groups,),
        in_specs=[pl.BlockSpec((group * 32, 128), lambda i: (i, 0))]
                 + [const_spec(a) for a in flat],
        out_specs=pl.BlockSpec((group, NUM_CLASSES_PAD), lambda i: (i, 0)),
        compiler_params=pltpu.CompilerParams(
            dimension_semantics=("parallel",),
            # ~11 MiB single-buffered weights + activations; 48 MiB leaves
            # headroom on all of v5e/v6e (128 MiB) and v7x (64 MiB/TC).
            vmem_limit_bytes=48 * 1024 * 1024),
    )(slab, *flat)
    return out[:n, :num_classes]


# --------------------------- parameter init ---------------------------------

def _fold_bn(key, c):
    """Generate BN params (gamma, beta, running mean/var) folded to scale/bias."""
    k1, k2, k3, k4 = jax.random.split(key, 4)
    gamma = 1.0 + 0.1 * jax.random.normal(k1, (c,), jnp.float32)
    beta = 0.1 * jax.random.normal(k2, (c,), jnp.float32)
    mean = 0.1 * jax.random.normal(k3, (c,), jnp.float32)
    var = jnp.abs(1.0 + 0.1 * jax.random.normal(k4, (c,), jnp.float32))
    scale = gamma * jax.lax.rsqrt(var + 1e-5)
    bias = beta - mean * scale
    return scale, bias


def _conv_w(key, kh, kw, cin, cout):
    return 0.05 * jax.random.normal(key, (kh, kw, cin, cout), jnp.float32)


def init_params(key, num_blocks=(1, 1, 1), num_classes=10):
    keys = iter(jax.random.split(key, 256))
    params = {}
    params["conv1_w"] = _conv_w(next(keys), 3, 3, 3, 16)
    params["bn1_s"], params["bn1_b"] = _fold_bn(next(keys), 16)

    in_planes = 16
    for layer_idx, (planes, nb, stride) in enumerate(
            zip((16, 32, 64), num_blocks, (1, 2, 2)), start=1):
        blocks = []
        strides = [stride] + [1] * (nb - 1)
        for s in strides:
            p = {}
            p["w1"] = _conv_w(next(keys), 3, 3, in_planes, planes)
            p["s1"], p["b1"] = _fold_bn(next(keys), planes)
            p["w2"] = _conv_w(next(keys), 3, 3, planes, planes)
            p["s2"], p["b2"] = _fold_bn(next(keys), planes)
            if s != 1 or in_planes != planes:
                p["ws"] = _conv_w(next(keys), 1, 1, in_planes, planes)
                p["ss"], p["bs"] = _fold_bn(next(keys), planes)
            blocks.append(p)
            in_planes = planes
        params[f"layer{layer_idx}"] = blocks

    params["fc_w"] = 0.05 * jax.random.normal(next(keys), (64, num_classes), jnp.float32)
    params["fc_b"] = 0.05 * jax.random.normal(next(keys), (num_classes,), jnp.float32)
    return params


# ------------------------------- main ---------------------------------------

if __name__ == "__main__":
    key = jax.random.PRNGKey(0)
    k_params, k_input = jax.random.split(key)

    # CIFAR input: 32x32 is required by avg_pool2d(out, 8) in the reference.
    # batch=16 with group=8 -> grid of 2 (both v7x TensorCores busy) and the
    # one-time banded-weight DMA is amortized over 16 images.
    batch = 16
    x = jax.random.normal(k_input, (batch, 3, 32, 32), jnp.float32)
    params = init_params(k_params, num_blocks=(1, 1, 1), num_classes=10)
    prepped = prepare_params(params, group=8, num_classes=10)

    fwd = jax.jit(lambda inp: resnet_cifar_forward(inp, prepped))
    logits = fwd(x)
    jax.block_until_ready(logits)
    assert logits.shape == (batch, 10) and logits.dtype == jnp.float32
    print("KERNEL_OK")
</pallas_src>

<mosaic_0001>
module attributes {stable_mosaic.version = 11 : i64} {
  func.func @k(%arg0: memref<8x128xf32, #tpu.memory_space<vmem>>, %arg1: memref<8x128xf32, #tpu.memory_space<vmem>>) attributes {dimension_semantics = [], scalar_prefetch = 0 : i64, scratch_operands = 0 : i64, tpu.core_type = #tpu.core_type<tc>} {
    %c0 = arith.constant 0 : index
    %c0_0 = arith.constant 0 : index
    %0 = vector.load %arg0[%c0, %c0_0] : memref<8x128xf32, #tpu.memory_space<vmem>>, vector<8x128xf32>
    %c1_i32 = arith.constant 1 : i32
    %1 = tpu.dynamic_rotate %0 by %c1_i32 dim 0 : vector<8x128xf32>, i32 -> vector<8x128xf32>
    %c0_1 = arith.constant 0 : index
    %c0_2 = arith.constant 0 : index
    %2 = vector.load %arg1[%c0_1, %c0_2] : memref<8x128xf32, #tpu.memory_space<vmem>>, vector<8x128xf32>
    tpu.vector_store %arg1[%c0_1, %c0_2], %1 {strides = array<i32>} : memref<8x128xf32, #tpu.memory_space<vmem>>, vector<8x128xf32>,
    return
  }
}

</mosaic_0001>

<bundles_post_ra>
// kernel: tpu_custom_call.1
= control target key start
LH: loop header
LB: loop body
LE: loop exit
PB: predicated region body
PF: predicated region fallthrough
CT: control target
= control target key end

     0   :  { %6 = vsyncpa [#allocation3], 0  ;;  %s125_s0 = inlined_call_operand.hbm [shape: f32[8,128], index: 0, kind: input, shape index: {}]   ;;  %s126_s1 = inlined_call_operand.hbm [shape: f32[8,128], index: 1, kind: output, shape index: {}]  }
   0x1   :  { %7 = vsyncpa [#allocation4], 0  ;;  %s89_s6 = smov [#allocation2]   ;;  %s41_s10 = scalar_lea.hbm %s125_s0, 128 }
   0x2   :  { %s14_s7 = sshll.u32 %s89_s6, 4  ;;  %p42_p0 = scmp.ne.s32.totalorder %s125_s0, %s41_s10  ;;  %s15_s7 = int_to_ptr.vmem [resolvable:$true] %s14_s7 }
   0x3   :  { %p45_p1 = scmp.lt.u32.totalorder %s41_s10, %s125_s0 }
   0x5   :  { %p47_p2 = pnand %p45_p1, %p42_p0 }
   0x7   :  { %50 = shalt.err (!%p47_p2)
}
   0x8   :  { %s51_s15 = scalar_lea.vmem %s15_s7, 128  ;;  %p56_p4 = scmp.lt.s32.totalorder %s15_s7, %s15_s7 }
   0x9   :  { %p52_p3 = scmp.ne.s32.totalorder %s15_s7, %s51_s15  ;;  %p57_p5 = scmp.lt.s32.totalorder %s51_s15, %s51_s15 }
   0xb   :  { %p58_p6 = por %p57_p5, %p56_p4 }
   0xd   :  { %p59_p7 = pnand %p58_p6, %p52_p3 }
   0xf   :  { %62 = shalt.err (!%p59_p7)
}
  0x10   :  { %17 = dma.hbm_to_vmem [thread:$0]  %s125_s0, 128, %s15_s7, [#allocation3]  }
  0x11   :  { %85 = dma.done.wait [#allocation3], 128  }
  0x12   :  { %86 = vsyncadd [#allocation3], 4294967168  ;;  %s90_s18 = smov [#allocation5]   ;;  %v21_v0 = vld [vmem:[#allocation2] sm:$0xff] }
  0x13   :  { %s30_s19 = sshll.u32 %s90_s18, 4  ;;  %v22_v1 = vrot.slane %v21_v0, 7  ;;  %s31_s19 = int_to_ptr.vmem [resolvable:$true] %s30_s19 }
  0x14   :  { %s63_s20 = scalar_lea.vmem %s31_s19, 128  ;;  %p68_p9 = scmp.lt.s32.totalorder %s31_s19, %s31_s19 }
  0x15   :  { %23 = vst [vmem:[#allocation5] sm:$0xff] %v22_v1  ;;  %p64_p8 = scmp.ne.s32.totalorder %s31_s19, %s63_s20  ;;  %p69_p10 = scmp.lt.s32.totalorder %s63_s20, %s63_s20 }
  0x17   :  { %p70_p11 = por %p69_p10, %p68_p9 }
  0x19   :  { %p71_p12 = pnand %p70_p11, %p64_p8 }
  0x1b   :  { %74 = shalt.err (!%p71_p12)
}
  0x1c   :  { %s75_s23 = scalar_lea.hbm %s126_s1, 128 }
  0x1d   :  { %p76_p13 = scmp.ne.s32.totalorder %s126_s1, %s75_s23  ;;  %p79_p0 = scmp.lt.u32.totalorder %s75_s23, %s126_s1 }
  0x1f   :  { %p81_p1 = pnand %p79_p0, %p76_p13 }
  0x21   :  { %84 = shalt.err (!%p81_p1)
}
  0x22   :  { %33 = dma.vmem_to_hbm [thread:$0]  %s31_s19, 128, %s126_s1, [#allocation4]  }
  0x23   :  { %87 = dma.done.wait [#allocation4], 128  }
  0x24   :  { %88 = vsyncadd [#allocation4], 4294967168 }
  0x25   :  { %37 = vsyncpa [#allocation3], 1 }
  0x26   :  { %38 = vsyncpa [#allocation4], 1 }

</bundles_post_ra>
